<compile_context>
chip_gen: v6e
topology: v6e:2x2x1
jax: 0.10.0
libtpu: 0.0.40
codegen_flags: <defaults>
</compile_context>

<pallas_src>
import functools

import jax
import jax.numpy as jnp
from jax import lax
from jax.experimental import pallas as pl
from jax.experimental.pallas import tpu as pltpu


def _hinge_loss_kernel(x_ref, y_ref, o_ref, *, n_rows, tile_n):
    # x_ref: (TILE_N, C) input dtype   y_ref: (TILE_N, 1) int32
    # o_ref: (8, 128) f32 partial-sum block (partial at [0, 0], zeros elsewhere)
    i = pl.program_id(0)

    x = x_ref[...].astype(jnp.float32)          # in-vreg upcast (bf16-safe)
    y = y_ref[...]                              # (TILE_N, 1) int32
    tn, c = x.shape

    # gather(-1, y) via one-hot masked row reduction (XLU-friendly).
    class_idx = lax.broadcasted_iota(jnp.int32, (tn, c), 1)
    s_y = jnp.sum(jnp.where(class_idx == y, x, 0.0), axis=-1, keepdims=True)

    hinge = jnp.maximum(1.0 + x - s_y, 0.0)     # (TILE_N, C)

    # Mask rows of a ragged last tile (their x/y contents are undefined).
    row_idx = i * tile_n + lax.broadcasted_iota(jnp.int32, (tn, 1), 0)
    hinge = jnp.where(row_idx < n_rows, hinge, 0.0)

    partial = jnp.sum(hinge)                    # per-tile scalar partial sum

    # Lane-dense, fully (8,128)-aligned unmasked store; only [0,0] is non-zero
    # so the wrapper-side jnp.sum over all partial blocks is exact.
    sub = lax.broadcasted_iota(jnp.int32, (8, 128), 0)
    lane = lax.broadcasted_iota(jnp.int32, (8, 128), 1)
    o_ref[...] = jnp.where((sub == 0) & (lane == 0), partial, 0.0)


def base_hinge_loss(x, y, *, tile_n=None):
    """x: (N, C) float logits (f32 or bf16), y: (N,) int labels -> scalar f32."""
    n, c = x.shape
    y2d = y.reshape(n, 1).astype(jnp.int32)
    x_bytes = jnp.dtype(x.dtype).itemsize

    if tile_n is None:
        # Target ~2 MiB of x per tile (double-buffered -> ~4 MiB in VMEM);
        # comfortably under scoped-VMEM limits on v5e/v6e/v7x.
        target_bytes = 2 * 1024 * 1024
        tile_n = target_bytes // (c * x_bytes)
    tile_n = int(tile_n)
    n_ceil8 = ((n + 7) // 8) * 8
    tile_n = min(tile_n, n_ceil8)
    tile_n = max(8, (tile_n // 8) * 8)
    n_tiles = pl.cdiv(n, tile_n)

    tile_x_bytes = tile_n * c * x_bytes
    vmem_limit = int(min(64 * 1024 * 1024, max(8 * 1024 * 1024, 6 * tile_x_bytes)))

    kernel = functools.partial(_hinge_loss_kernel, n_rows=n, tile_n=tile_n)

    partials = pl.pallas_call(
        kernel,
        out_shape=jax.ShapeDtypeStruct((8 * n_tiles, 128), jnp.float32),
        grid_spec=pltpu.PrefetchScalarGridSpec(
            num_scalar_prefetch=0,
            grid=(n_tiles,),
            in_specs=[
                pl.BlockSpec((tile_n, c), lambda i: (i, 0)),
                pl.BlockSpec((tile_n, 1), lambda i: (i, 0)),
            ],
            out_specs=pl.BlockSpec((8, 128), lambda i: (i, 0)),
        ),
        compiler_params=pltpu.CompilerParams(
            dimension_semantics=("parallel",),   # v7x: shard tiles across both TCs
            vmem_limit_bytes=vmem_limit,
        ),
        cost_estimate=pl.CostEstimate(
            flops=6 * n * c,
            transcendentals=0,
            bytes_accessed=n * c * x_bytes + n * 4 + 8 * n_tiles * 128 * 4,
        ),
    )(x, y2d)

    # Tiny epilogue in JAX: sum the per-tile partials and normalize.
    return jnp.sum(partials) / jnp.float32(n * c)


def _reference(x, y):
    s_y = jnp.take_along_axis(x.astype(jnp.float32), y.reshape(-1, 1), axis=-1)
    return jnp.mean(jnp.maximum(1.0 + x.astype(jnp.float32) - s_y, 0.0))


if __name__ == "__main__":
    key = jax.random.PRNGKey(0)
    kx, ky = jax.random.split(key)

    # Small shapes consistent with the module: x (N, C) logits, y (N,) labels.
    N, C = 16, 32
    x = jax.random.normal(kx, (N, C), dtype=jnp.float32)
    y = jax.random.randint(ky, (N,), 0, C, dtype=jnp.int32)

    loss = base_hinge_loss(x, y)
    jax.block_until_ready(loss)
    ref = _reference(x, y)
    assert jnp.allclose(loss, ref, atol=1e-5, rtol=1e-5), (loss, ref)

    # Ragged multi-tile check (N not a multiple of tile_n) exercising the
    # row mask, the per-tile partial sums, and the parallel grid axis.
    N2, C2 = 20, 32
    x2 = jax.random.normal(kx, (N2, C2), dtype=jnp.float32)
    y2 = jax.random.randint(ky, (N2,), 0, C2, dtype=jnp.int32)
    loss2 = base_hinge_loss(x2, y2, tile_n=8)
    jax.block_until_ready(loss2)
    ref2 = _reference(x2, y2)
    assert jnp.allclose(loss2, ref2, atol=1e-5, rtol=1e-5), (loss2, ref2)

    print("KERNEL_OK")
</pallas_src>

<mosaic_0001>
module attributes {stable_mosaic.version = 11 : i64} {
  func.func @_hinge_loss_kernel(%arg0: i32, %arg1: memref<16x32xf32, #tpu.memory_space<vmem>>, %arg2: memref<16x1xi32, #tpu.memory_space<vmem>>, %arg3: memref<8x128xf32, #tpu.memory_space<vmem>>) attributes {dimension_semantics = [#tpu.dimension_semantics<parallel>], iteration_bounds = array<i64: 1>, scalar_prefetch = 0 : i64, scratch_operands = 0 : i64, tpu.core_type = #tpu.core_type<tc>, window_params = [{transform_indices = @transform_0, window_bounds = array<i64: 16, 32>}, {transform_indices = @transform_1, window_bounds = array<i64: 16, 1>}, {transform_indices = @transform_2, window_bounds = array<i64: 8, 128>}]} {
    %c0 = arith.constant 0 : index
    %c0_0 = arith.constant 0 : index
    %0 = vector.load %arg1[%c0, %c0_0] : memref<16x32xf32, #tpu.memory_space<vmem>>, vector<16x32xf32>
    %c0_1 = arith.constant 0 : index
    %c0_2 = arith.constant 0 : index
    %1 = vector.load %arg2[%c0_1, %c0_2] : memref<16x1xi32, #tpu.memory_space<vmem>>, vector<16x1xi32>
    %2 = tpu.iota {dimensions = array<i32: 1>} : vector<16x32xi32>
    %3 = vector.broadcast %1 : vector<16x1xi32> to vector<16x32xi32>
    %4 = arith.cmpi eq, %2, %3 : vector<16x32xi32>
    %cst = arith.constant 0.000000e+00 : f32
    %5 = vector.broadcast %cst : f32 to vector<16x32xf32>
    %6 = arith.select %4, %0, %5 : vector<16x32xi1>, vector<16x32xf32>
    %cst_3 = arith.constant dense<0.000000e+00> : vector<16xf32>
    %7 = vector.multi_reduction <add>, %6, %cst_3 [1] : vector<16x32xf32> to vector<16xf32>
    %8 = vector.shape_cast %7 : vector<16xf32> to vector<16x1xf32>
    %cst_4 = arith.constant 1.000000e+00 : f32
    %9 = vector.broadcast %cst_4 : f32 to vector<16x32xf32>
    %10 = arith.addf %9, %0 : vector<16x32xf32>
    %11 = vector.broadcast %8 : vector<16x1xf32> to vector<16x32xf32>
    %12 = arith.subf %10, %11 : vector<16x32xf32>
    %cst_5 = arith.constant 0.000000e+00 : f32
    %13 = vector.broadcast %cst_5 : f32 to vector<16x32xf32>
    %14 = arith.maximumf %12, %13 : vector<16x32xf32>
    %c16_i32 = arith.constant 16 : i32
    %15 = arith.muli %arg0, %c16_i32 : i32
    %16 = tpu.iota {dimensions = array<i32: 0>} : vector<16x1xi32>
    %17 = vector.broadcast %15 : i32 to vector<16x1xi32>
    %18 = arith.addi %17, %16 : vector<16x1xi32>
    %c16_i32_6 = arith.constant 16 : i32
    %19 = vector.broadcast %c16_i32_6 : i32 to vector<16x1xi32>
    %20 = arith.cmpi slt, %18, %19 : vector<16x1xi32>
    %cst_7 = arith.constant 0.000000e+00 : f32
    %21 = vector.shape_cast %20 : vector<16x1xi1> to vector<16x1xi1>
    %22 = vector.broadcast %21 : vector<16x1xi1> to vector<16x32xi1>
    %23 = vector.broadcast %cst_7 : f32 to vector<16x32xf32>
    %24 = arith.select %22, %14, %23 : vector<16x32xi1>, vector<16x32xf32>
    %25 = vector.shape_cast %24 : vector<16x32xf32> to vector<1x16x32xf32>
    %cst_8 = arith.constant dense<0.000000e+00> : vector<1xf32>
    %26 = vector.multi_reduction <add>, %25, %cst_8 [1, 2] : vector<1x16x32xf32> to vector<1xf32>
    %27 = vector.shape_cast %26 : vector<1xf32> to vector<1x1x1xf32>
    %28 = vector.extract %27[0, 0, 0] : f32 from vector<1x1x1xf32>
    %29 = tpu.iota {dimensions = array<i32: 0>} : vector<8x128xi32>
    %30 = tpu.iota {dimensions = array<i32: 1>} : vector<8x128xi32>
    %c0_i32 = arith.constant 0 : i32
    %31 = vector.broadcast %c0_i32 : i32 to vector<8x128xi32>
    %32 = arith.cmpi eq, %29, %31 : vector<8x128xi32>
    %c0_i32_9 = arith.constant 0 : i32
    %33 = vector.broadcast %c0_i32_9 : i32 to vector<8x128xi32>
    %34 = arith.cmpi eq, %30, %33 : vector<8x128xi32>
    %35 = arith.andi %32, %34 : vector<8x128xi1>
    %cst_10 = arith.constant 0.000000e+00 : f32
    %36 = vector.broadcast %28 : f32 to vector<8x128xf32>
    %37 = vector.broadcast %cst_10 : f32 to vector<8x128xf32>
    %38 = arith.select %35, %36, %37 : vector<8x128xi1>, vector<8x128xf32>
    %c0_11 = arith.constant 0 : index
    %c0_12 = arith.constant 0 : index
    %39 = vector.load %arg3[%c0_11, %c0_12] : memref<8x128xf32, #tpu.memory_space<vmem>>, vector<8x128xf32>
    tpu.vector_store %arg3[%c0_11, %c0_12], %38 {strides = array<i32>} : memref<8x128xf32, #tpu.memory_space<vmem>>, vector<8x128xf32>,
    return
  }
  func.func @transform_0(%arg0: i32) -> (i32, i32) {
    %c0_i32 = arith.constant 0 : i32
    %c0_i32_0 = arith.constant 0 : i32
    return %arg0, %c0_i32 : i32, i32
  }
  func.func @transform_1(%arg0: i32) -> (i32, i32) {
    %c0_i32 = arith.constant 0 : i32
    %c0_i32_0 = arith.constant 0 : i32
    return %arg0, %c0_i32 : i32, i32
  }
  func.func @transform_2(%arg0: i32) -> (i32, i32) {
    %c0_i32 = arith.constant 0 : i32
    %c0_i32_0 = arith.constant 0 : i32
    return %arg0, %c0_i32 : i32, i32
  }
}

</mosaic_0001>

<bundles_post_ra>
// kernel: tpu_custom_call.1
= control target key start
LH: loop header
LB: loop body
LE: loop exit
PB: predicated region body
PF: predicated region fallthrough
CT: control target
= control target key end

     0   :  { %v115_v1 = vmov 0   ;;  %s151_s0 = inlined_call_operand.vmem [shape: f32[16,32], index: 0, kind: input, shape index: {}]   ;;  %s152_s1 = inlined_call_operand.vmem [shape: s32[16,1], index: 1, kind: input, shape index: {}]   ;;  %s153_s2 = inlined_call_operand.hbm [shape: f32[8,128], index: 2, kind: output, shape index: {}]  }
   0x1   :  { %v14_v0 = vld [vmem:[%s152_s1] sm:$0xff]  ;;  %92 = vset.pattern.permute.xlu0 %v115_v1 }
   0x2   :  { %7 = vsyncpa [#allocation3], 0  ;;  %19 = vperm.xlu0 %92, %v14_v0   ;;  %v15_v2 = vld [vmem:[%s152_s1 + $0x8] sm:$0xff]  ;;  %v16_v3 = vlaneseq  ;;  %v12_v5 = vld [vmem:[%s151_s0] sm:$0xff]  ;;  %vm28_vm0 = vcmask 261120  }
   0x3   :  { %v13_v9 = vld [vmem:[%s151_s0 + $0x8] sm:$0xff]  ;;  %v35_v13 = vadd.f32 1.0, %v12_v5  ;;  %s116_s0 = smov [#allocation2]  }
   0x4   :  { %v17_v4 = vand.u32 127, %v16_v3  ;;  %v36_v16 = vadd.f32 1.0, %v13_v9  ;;  %v43_v31 = vshrl.u32 %v16_v3, 7  ;;  %s80_s1 = sshll.u32 %s116_s0, 4  ;;  %s81_s1 = int_to_ptr.vmem [resolvable:$true] %s80_s1 }
   0x5   :  { %s93_s18 = scalar_lea.vmem %s81_s1, 128  ;;  %p98_p1 = scmp.lt.s32.totalorder %s81_s1, %s81_s1 }
   0x6   :  { %22 = vperm.xlu0 %92, %v15_v2   ;;  %vm68_vm3 = vcmp.eq.s32.totalorder %v43_v31, 0  ;;  %vm69_vm4 = vcmp.eq.s32.totalorder %v17_v4, 0  ;;  %p94_p0 = scmp.ne.s32.totalorder %s81_s1, %s93_s18  ;;  %p99_p2 = scmp.lt.s32.totalorder %s93_s18, %s93_s18 }
   0x7   :  { %vm70_vm5 = vmand %vm68_vm3, %vm69_vm4 }
   0x8   :  { %p100_p3 = por %p99_p2, %p98_p1 }
   0xa   :  { %p101_p4 = pnand %p100_p3, %p94_p0 }
  0x7d   :  { %v20_v6 = vpop.permute.xlu0 %19 }
  0x7e   :  { %vm24_vm1 = vcmp.eq.s32.totalorder %v17_v4, %v20_v6 }
  0x7f   :  { %v26_v7 = vsel %vm24_vm1, %v12_v5, 0.0 }
  0x80   :  { %v29_v8 = vsel %vm28_vm0, %v26_v7, 0.0 }
  0x81   :  { %v23_v10 = vpop.permute.xlu0 %22  ;;  %30 = vadd.xlane.f32.xlu1 %v29_v8 }
  0x82   :  { %vm25_vm2 = vcmp.eq.s32.totalorder %v17_v4, %v23_v10 }
  0x83   :  { %v27_v11 = vsel %vm25_vm2, %v13_v9, 0.0 }
  0x84   :  { %v32_v12 = vsel %vm28_vm0, %v27_v11, 0.0 }
  0x85   :  { %33 = vadd.xlane.f32.xlu1 %v32_v12 }
 0x10a   :  { %v31_v14 = vpop.xlane.xlu1 %30 }
 0x10b   :  { %v37_v15 = vsub.f32 %v35_v13, %v31_v14 }
 0x10d   :  { %v39_v18 = vmax.f32 %v37_v15, 0.0 }
 0x10e   :  { %v34_v17 = vpop.xlane.xlu1 %33 }
 0x10f   :  { %v38_v19 = vsub.f32 %v36_v16, %v34_v17  ;;  %v56_v21 = vsel %vm28_vm0, %v39_v18, 0.0 }
 0x111   :  { %v40_v20 = vmax.f32 %v38_v19, 0.0 }
 0x113   :  { %v57_v22 = vsel %vm28_vm0, %v40_v20, 0.0 }
 0x114   :  { %v58_v23 = vadd.f32 %v57_v22, %v56_v21 }
 0x116   :  { %59 = vadd.xlane.f32.xlu0 %v58_v23 }
 0x19f   :  { %v60_v24 = vpop.xlane.xlu0 %59 }
 0x1a0   :  { %v61_v25 = vrot.slane %v60_v24, 4 }
 0x1a2   :  { %v62_v26 = vadd.f32 %v61_v25, %v60_v24 }
 0x1a4   :  { %v63_v27 = vrot.slane %v62_v26, 2 }
 0x1a6   :  { %v64_v28 = vadd.f32 %v63_v27, %v62_v26 }
 0x1a8   :  { %v65_v29 = vrot.slane %v64_v28, 1 }
 0x1aa   :  { %v66_v30 = vadd.f32 %v65_v29, %v64_v28 }
 0x1ac   :  { %88 = vpush %v66_v30 }
 0x1dd   :  { %s89_s17 = spop %88 }
 0x1de   :  { %v71_v32 = vstv %s89_s17 }
 0x1df   :  { %v72_v33 = vsel %vm70_vm5, %v71_v32, 0.0 }
 0x1e0   :  { %73 = vst [vmem:[#allocation2] sm:$0xff] %v72_v33 }
 0x1e1   :  { %104 = shalt.err (!%p101_p4)
}
 0x1e2   :  { %83 = dma.vmem_to_hbm [thread:$0]  %s81_s1, 128, %s153_s2, [#allocation3]  }
 0x1e3   :  { %113 = dma.done.wait [#allocation3], 128  }
 0x1e4   :  { %114 = vsyncadd [#allocation3], 4294967168 }
 0x1e5   :  { %87 = vsyncpa [#allocation3], 1 }

</bundles_post_ra>
